<compile_context>
chip_gen: v6e
topology: v6e:2x2x1
jax: 0.10.0
libtpu: 0.0.40
codegen_flags: <defaults>
</compile_context>

<pallas_src>
import functools

import jax
import jax.numpy as jnp
import numpy as np
from jax.experimental import pallas as pl
from jax.experimental.pallas import tpu as pltpu


def _round_up(v, d):
    return (v + d - 1) // d * d


def _taploss_kernel(qp_ref, t_ref, x_ref, lab_ref, mask_ref, out_ref,
                    c_acc, cp_acc, np_acc, *, nq, use_mask):
    m_idx = pl.program_id(1)

    @pl.when(m_idx == 0)
    def _init():
        c_acc[...] = jnp.zeros_like(c_acc)
        cp_acc[...] = jnp.zeros_like(cp_acc)
        np_acc[...] = jnp.zeros_like(np_acc)

    x = x_ref[...]        # (TN, TM) f32
    lab = lab_ref[...]    # (TN, TM) f32 in {0, 1} (zero-padded)
    if use_mask:
        cmask = mask_ref[...]   # (1, TM) column-validity mask

    tn = x.shape[0]
    bin_iota = jax.lax.broadcasted_iota(jnp.int32, (1, nq), 1)

    def bin_body(k, carry):
        c_t, cp_t = carry
        # Quantizer params for bin k (scalar reads from SMEM).
        w1k = qp_ref[0, k]
        b1k = qp_ref[1, k]
        w2k = qp_ref[2, k]
        b2k = qp_ref[3, k]
        # q_k = relu(min(w1*x + b1, w2*x + b2)) on the (TN, TM) tile.
        q1 = x * w1k + b1k
        q2 = x * w2k + b2k
        qk = jnp.maximum(jnp.minimum(q1, q2), 0.0)
        qc = qk * cmask if use_mask else qk
        # Fused reductions over the M (lane) axis: no (nq, TN, TM) temporaries.
        ck = jnp.sum(qc, axis=-1, keepdims=True)          # (TN, 1)
        cpk = jnp.sum(qk * lab, axis=-1, keepdims=True)   # (TN, 1) (lab is masked)
        sel = (bin_iota == k).astype(jnp.float32)         # (1, nq) one-hot column
        return c_t + ck * sel, cp_t + cpk * sel

    zeros = jnp.zeros((tn, nq), jnp.float32)
    c_tile, cp_tile = jax.lax.fori_loop(0, nq, bin_body, (zeros, zeros))

    c_acc[...] += c_tile
    cp_acc[...] += cp_tile
    np_acc[...] += jnp.sum(lab, axis=-1, keepdims=True)

    @pl.when(m_idx == pl.num_programs(1) - 1)
    def _finalize():
        c = c_acc[...]        # (TN, nq)
        cp = cp_acc[...]      # (TN, nq)
        Np = np_acc[...]      # (TN, 1)
        t_exc = t_ref[...]    # (nq, nq) strict upper-triangular ones

        # Exclusive cumsums via MXU; inclusive C recovered with one VPU add.
        C_1d = jnp.dot(c, t_exc, preferred_element_type=jnp.float32)
        Cp_1d = jnp.dot(cp, t_exc, preferred_element_type=jnp.float32)
        C = C_1d + c

        eps = 1e-8
        ratio = jnp.maximum(cp - 1.0, 0.0) / (jnp.maximum(c - 1.0, 0.0) + eps)
        aps_t = (cp
                 * (c * ratio + (Cp_1d + 1.0 - ratio * (C_1d + 1.0))
                    * jnp.log((C + 1.0) / (C_1d + 1.0)))
                 / (c + eps))
        out_ref[...] = jnp.sum(aps_t, axis=-1, keepdims=True) / Np


def make_quantizer_params(nq=25, min_v=0.0, max_v=1.0):
    """Deterministic quantizer weights matching APLoss.__init__ (packed (4, nq))."""
    gap = max_v - min_v
    a = (nq - 1) / gap
    w1 = np.full((nq,), -a, np.float32)
    b1 = (a * min_v + np.arange(nq, 0, -1)).astype(np.float32)
    w2 = np.full((nq,), a, np.float32)
    b2 = (np.arange(2 - nq, 2, 1) - a * min_v).astype(np.float32)
    # q.weight[0] = q.weight[-1] = 0 ; q.bias[0] = q.bias[-1] = 1
    w1[0] = 0.0
    b1[0] = 1.0
    w2[-1] = 0.0
    b2[-1] = 1.0
    return jnp.asarray(np.stack([w1, b1, w2, b2], axis=0))   # (4, nq)


def make_exclusive_cumsum_matrix(nq):
    idx = np.arange(nq)
    return jnp.asarray((idx[:, None] < idx[None, :]).astype(np.float32))  # (nq, nq)


@functools.partial(jax.jit, static_argnames=("nq", "tn", "tm"))
def tap_loss(x, label, qp, t_exc, *, nq=25, tn=128, tm=512):
    """1 - mAP for the tie-aware AP loss (TAPLoss.forward, simplified=False)."""
    x = x.astype(jnp.float32)
    label = label.astype(jnp.float32)
    N, M = x.shape

    tn_eff = min(tn, _round_up(N, 8))
    tm_eff = min(tm, _round_up(M, 128))
    n_pad = _round_up(N, tn_eff)
    m_pad = _round_up(M, tm_eff)
    use_mask = (m_pad != M)

    xp = jnp.pad(x, ((0, n_pad - N), (0, m_pad - M)))
    lp = jnp.pad(label, ((0, n_pad - N), (0, m_pad - M)))
    colmask = (jnp.arange(m_pad) < M).astype(jnp.float32)[None, :]   # (1, m_pad)

    grid = (n_pad // tn_eff, m_pad // tm_eff)

    aps = pl.pallas_call(
        functools.partial(_taploss_kernel, nq=nq, use_mask=use_mask),
        out_shape=jax.ShapeDtypeStruct((n_pad, 1), jnp.float32),
        grid=grid,
        in_specs=[
            pl.BlockSpec(memory_space=pltpu.MemorySpace.SMEM),          # qp (4, nq)
            pl.BlockSpec((nq, nq), lambda i, m: (0, 0)),                # t_exc
            pl.BlockSpec((tn_eff, tm_eff), lambda i, m: (i, m)),        # x tile
            pl.BlockSpec((tn_eff, tm_eff), lambda i, m: (i, m)),        # label tile
            pl.BlockSpec((1, tm_eff), lambda i, m: (0, m)),             # column mask
        ],
        out_specs=pl.BlockSpec((tn_eff, 1), lambda i, m: (i, 0)),
        scratch_shapes=[
            pltpu.VMEM((tn_eff, nq), jnp.float32),   # c accumulator
            pltpu.VMEM((tn_eff, nq), jnp.float32),   # cp accumulator
            pltpu.VMEM((tn_eff, 1), jnp.float32),    # Np accumulator
        ],
        compiler_params=pltpu.CompilerParams(
            dimension_semantics=("parallel", "arbitrary")),
    )(qp, t_exc, xp, lp, colmask)

    # ret == '1-mAP', qw=None  (plain-JAX glue on the tiny (N,) result).
    return 1.0 - jnp.mean(aps[:N, 0])


def tap_loss_reference(x, label, qp, nq=25):
    """Pure-JAX reference mirroring PyTorch TAPLoss.forward (simplified=False)."""
    x = x.astype(jnp.float32)
    label = label.astype(jnp.float32)
    N, M = x.shape
    w1, b1, w2, b2 = qp[0], qp[1], qp[2], qp[3]
    q1 = w1[None, :, None] * x[:, None, :] + b1[None, :, None]
    q2 = w2[None, :, None] * x[:, None, :] + b2[None, :, None]
    q = jnp.clip(jnp.minimum(q1, q2), 0.0, None)
    c = q.sum(-1)
    cp = (q * label[:, None, :]).sum(-1)
    Np = label.sum(-1, keepdims=True)
    C = jnp.cumsum(c, -1)
    Cp = jnp.cumsum(cp, -1)
    zeros = jnp.zeros((N, 1), jnp.float32)
    C_1d = jnp.concatenate([zeros, C[:, :-1]], -1)
    Cp_1d = jnp.concatenate([zeros, Cp[:, :-1]], -1)
    eps = 1e-8
    ratio = jnp.maximum(cp - 1, 0.0) / (jnp.maximum(c - 1, 0.0) + eps)
    aps = cp * (c * ratio + (Cp_1d + 1 - ratio * (C_1d + 1))
                * jnp.log((C + 1) / (C_1d + 1))) / (c + eps) / Np
    return 1.0 - aps.sum(-1).mean()


if __name__ == "__main__":
    NQ = 25
    qp = make_quantizer_params(nq=NQ, min_v=0.0, max_v=1.0)
    t_exc = make_exclusive_cumsum_matrix(NQ)

    key = jax.random.PRNGKey(0)
    # Small shapes that still exercise the grid:
    #   (8, 300): 3 M-tiles with ragged last tile (mask path), single N-tile.
    #   (16, 256): 2 N-tiles x 2 M-tiles, aligned (no-mask path).
    for (n, m) in [(8, 300), (16, 256)]:
        key, kx, kl = jax.random.split(key, 3)
        x = jax.random.uniform(kx, (n, m), jnp.float32)                 # values in [0, 1]
        label = (jax.random.uniform(kl, (n, m)) < 0.5).astype(jnp.float32)

        loss = tap_loss(x, label, qp, t_exc, nq=NQ, tn=8, tm=128)
        loss = jax.block_until_ready(loss)

        ref = tap_loss_reference(x, label, qp, nq=NQ)
        if not np.allclose(np.asarray(loss), np.asarray(ref), rtol=1e-4, atol=1e-5):
            raise AssertionError(f"mismatch at {(n, m)}: kernel={loss} ref={ref}")

    print("KERNEL_OK")
</pallas_src>

<mosaic_0001>
module attributes {stable_mosaic.version = 11 : i64} {
  func.func @_taploss_kernel(%arg0: i32, %arg1: i32, %arg2: memref<4x25xf32, #tpu.memory_space<smem>>, %arg3: memref<25x25xf32, #tpu.memory_space<vmem>>, %arg4: memref<8x128xf32, #tpu.memory_space<vmem>>, %arg5: memref<8x128xf32, #tpu.memory_space<vmem>>, %arg6: memref<1x128xf32, #tpu.memory_space<vmem>>, %arg7: memref<8x1xf32, #tpu.memory_space<vmem>>, %arg8: memref<8x25xf32, #tpu.memory_space<vmem>>, %arg9: memref<8x25xf32, #tpu.memory_space<vmem>>, %arg10: memref<8x1xf32, #tpu.memory_space<vmem>>) attributes {dimension_semantics = [#tpu.dimension_semantics<parallel>, #tpu.dimension_semantics<arbitrary>], iteration_bounds = array<i64: 1, 3>, scalar_prefetch = 0 : i64, scratch_operands = 3 : i64, tpu.core_type = #tpu.core_type<tc>, window_params = [{transform_indices = @transform_0, window_bounds = array<i64: 4, 25>}, {pipeline_mode = #tpu.pipeline_mode<synchronous>, transform_indices = @transform_1, window_bounds = array<i64: 25, 25>}, {transform_indices = @transform_2, window_bounds = array<i64: 8, 128>}, {transform_indices = @transform_3, window_bounds = array<i64: 8, 128>}, {transform_indices = @transform_4, window_bounds = array<i64: 1, 128>}, {transform_indices = @transform_5, window_bounds = array<i64: 8, 1>}]} {
    %c0_i32 = arith.constant 0 : i32
    %0 = arith.cmpi eq, %arg1, %c0_i32 : i32
    %1 = arith.extui %0 : i1 to i32
    %c0_i32_0 = arith.constant 0 : i32
    %2 = arith.cmpi ne, %1, %c0_i32_0 : i32
    scf.if %2 {
      %cst_22 = arith.constant 0.000000e+00 : f32
      %24 = vector.broadcast %cst_22 : f32 to vector<8x25xf32>
      %c0_23 = arith.constant 0 : index
      %c0_24 = arith.constant 0 : index
      %25 = vector.load %arg8[%c0_23, %c0_24] : memref<8x25xf32, #tpu.memory_space<vmem>>, vector<8x25xf32>
      tpu.vector_store %arg8[%c0_23, %c0_24], %24 {strides = array<i32>} : memref<8x25xf32, #tpu.memory_space<vmem>>, vector<8x25xf32>,
      %cst_25 = arith.constant 0.000000e+00 : f32
      %26 = vector.broadcast %cst_25 : f32 to vector<8x25xf32>
      %c0_26 = arith.constant 0 : index
      %c0_27 = arith.constant 0 : index
      %27 = vector.load %arg9[%c0_26, %c0_27] : memref<8x25xf32, #tpu.memory_space<vmem>>, vector<8x25xf32>
      tpu.vector_store %arg9[%c0_26, %c0_27], %26 {strides = array<i32>} : memref<8x25xf32, #tpu.memory_space<vmem>>, vector<8x25xf32>,
      %cst_28 = arith.constant 0.000000e+00 : f32
      %28 = vector.broadcast %cst_28 : f32 to vector<8x1xf32>
      %c0_29 = arith.constant 0 : index
      %c0_30 = arith.constant 0 : index
      %29 = vector.load %arg10[%c0_29, %c0_30] : memref<8x1xf32, #tpu.memory_space<vmem>>, vector<8x1xf32>
      tpu.vector_store %arg10[%c0_29, %c0_30], %28 {strides = array<i32>} : memref<8x1xf32, #tpu.memory_space<vmem>>, vector<8x1xf32>,
    } else {
    }
    %c0 = arith.constant 0 : index
    %c0_1 = arith.constant 0 : index
    %3 = vector.load %arg4[%c0, %c0_1] : memref<8x128xf32, #tpu.memory_space<vmem>>, vector<8x128xf32>
    %c0_2 = arith.constant 0 : index
    %c0_3 = arith.constant 0 : index
    %4 = vector.load %arg5[%c0_2, %c0_3] : memref<8x128xf32, #tpu.memory_space<vmem>>, vector<8x128xf32>
    %c0_4 = arith.constant 0 : index
    %c0_5 = arith.constant 0 : index
    %5 = vector.load %arg6[%c0_4, %c0_5] : memref<1x128xf32, #tpu.memory_space<vmem>>, vector<1x128xf32>
    %6 = tpu.iota {dimensions = array<i32: 1>} : vector<1x25xi32>
    %cst = arith.constant 0.000000e+00 : f32
    %7 = vector.broadcast %cst : f32 to vector<8x25xf32>
    %c0_i32_6 = arith.constant 0 : i32
    %c25_i32 = arith.constant 25 : i32
    %8 = arith.addi %c0_i32_6, %c25_i32 : i32
    %c1_i32 = arith.constant 1 : i32
    %9:2 = scf.for %arg11 = %c0_i32_6 to %8 step %c1_i32 iter_args(%arg12 = %7, %arg13 = %7) -> (vector<8x25xf32>, vector<8x25xf32>)  : i32 {
      %c0_22 = arith.constant 0 : index
      %24 = arith.index_cast %arg11 : i32 to index
      %25 = memref.load %arg2[%c0_22, %24] : memref<4x25xf32, #tpu.memory_space<smem>>
      %c1 = arith.constant 1 : index
      %26 = arith.index_cast %arg11 : i32 to index
      %27 = memref.load %arg2[%c1, %26] : memref<4x25xf32, #tpu.memory_space<smem>>
      %c2 = arith.constant 2 : index
      %28 = arith.index_cast %arg11 : i32 to index
      %29 = memref.load %arg2[%c2, %28] : memref<4x25xf32, #tpu.memory_space<smem>>
      %c3 = arith.constant 3 : index
      %30 = arith.index_cast %arg11 : i32 to index
      %31 = memref.load %arg2[%c3, %30] : memref<4x25xf32, #tpu.memory_space<smem>>
      %32 = vector.broadcast %25 : f32 to vector<8x128xf32>
      %33 = arith.mulf %3, %32 : vector<8x128xf32>
      %34 = vector.broadcast %27 : f32 to vector<8x128xf32>
      %35 = arith.addf %33, %34 : vector<8x128xf32>
      %36 = vector.broadcast %29 : f32 to vector<8x128xf32>
      %37 = arith.mulf %3, %36 : vector<8x128xf32>
      %38 = vector.broadcast %31 : f32 to vector<8x128xf32>
      %39 = arith.addf %37, %38 : vector<8x128xf32>
      %40 = arith.minimumf %35, %39 : vector<8x128xf32>
      %cst_23 = arith.constant 0.000000e+00 : f32
      %41 = vector.broadcast %cst_23 : f32 to vector<8x128xf32>
      %42 = arith.maximumf %40, %41 : vector<8x128xf32>
      %43 = vector.broadcast %5 : vector<1x128xf32> to vector<8x128xf32>
      %44 = arith.mulf %42, %43 : vector<8x128xf32>
      %cst_24 = arith.constant dense<0.000000e+00> : vector<8xf32>
      %45 = vector.multi_reduction <add>, %44, %cst_24 [1] : vector<8x128xf32> to vector<8xf32>
      %46 = vector.shape_cast %45 : vector<8xf32> to vector<8x1xf32>
      %47 = arith.mulf %42, %4 : vector<8x128xf32>
      %cst_25 = arith.constant dense<0.000000e+00> : vector<8xf32>
      %48 = vector.multi_reduction <add>, %47, %cst_25 [1] : vector<8x128xf32> to vector<8xf32>
      %49 = vector.shape_cast %48 : vector<8xf32> to vector<8x1xf32>
      %50 = vector.broadcast %arg11 : i32 to vector<1x25xi32>
      %51 = arith.cmpi eq, %6, %50 : vector<1x25xi32>
      %52 = arith.extui %51 : vector<1x25xi1> to vector<1x25xi32>
      %53 = arith.sitofp %52 : vector<1x25xi32> to vector<1x25xf32>
      %54 = vector.broadcast %46 : vector<8x1xf32> to vector<8x25xf32>
      %55 = vector.broadcast %53 : vector<1x25xf32> to vector<8x25xf32>
      %56 = arith.mulf %54, %55 : vector<8x25xf32>
      %57 = arith.addf %arg12, %56 : vector<8x25xf32>
      %58 = vector.broadcast %49 : vector<8x1xf32> to vector<8x25xf32>
      %59 = vector.broadcast %53 : vector<1x25xf32> to vector<8x25xf32>
      %60 = arith.mulf %58, %59 : vector<8x25xf32>
      %61 = arith.addf %arg13, %60 : vector<8x25xf32>
      scf.yield %57, %61 : vector<8x25xf32>, vector<8x25xf32>
    }
    %c25_i32_7 = arith.constant 25 : i32
    %c0_8 = arith.constant 0 : index
    %c0_9 = arith.constant 0 : index
    %10 = vector.load %arg8[%c0_8, %c0_9] : memref<8x25xf32, #tpu.memory_space<vmem>>, vector<8x25xf32>
    %11 = arith.addf %10, %9#0 : vector<8x25xf32>
    %c0_10 = arith.constant 0 : index
    %c0_11 = arith.constant 0 : index
    %12 = vector.load %arg8[%c0_10, %c0_11] : memref<8x25xf32, #tpu.memory_space<vmem>>, vector<8x25xf32>
    tpu.vector_store %arg8[%c0_10, %c0_11], %11 {strides = array<i32>} : memref<8x25xf32, #tpu.memory_space<vmem>>, vector<8x25xf32>,
    %c0_12 = arith.constant 0 : index
    %c0_13 = arith.constant 0 : index
    %13 = vector.load %arg9[%c0_12, %c0_13] : memref<8x25xf32, #tpu.memory_space<vmem>>, vector<8x25xf32>
    %14 = arith.addf %13, %9#1 : vector<8x25xf32>
    %c0_14 = arith.constant 0 : index
    %c0_15 = arith.constant 0 : index
    %15 = vector.load %arg9[%c0_14, %c0_15] : memref<8x25xf32, #tpu.memory_space<vmem>>, vector<8x25xf32>
    tpu.vector_store %arg9[%c0_14, %c0_15], %14 {strides = array<i32>} : memref<8x25xf32, #tpu.memory_space<vmem>>, vector<8x25xf32>,
    %c0_16 = arith.constant 0 : index
    %c0_17 = arith.constant 0 : index
    %16 = vector.load %arg10[%c0_16, %c0_17] : memref<8x1xf32, #tpu.memory_space<vmem>>, vector<8x1xf32>
    %cst_18 = arith.constant dense<0.000000e+00> : vector<8xf32>
    %17 = vector.multi_reduction <add>, %4, %cst_18 [1] : vector<8x128xf32> to vector<8xf32>
    %18 = vector.shape_cast %17 : vector<8xf32> to vector<8x1xf32>
    %19 = arith.addf %16, %18 : vector<8x1xf32>
    %c0_19 = arith.constant 0 : index
    %c0_20 = arith.constant 0 : index
    %20 = vector.load %arg10[%c0_19, %c0_20] : memref<8x1xf32, #tpu.memory_space<vmem>>, vector<8x1xf32>
    tpu.vector_store %arg10[%c0_19, %c0_20], %19 {strides = array<i32>} : memref<8x1xf32, #tpu.memory_space<vmem>>, vector<8x1xf32>,
    %c2_i32 = arith.constant 2 : i32
    %21 = arith.cmpi eq, %arg1, %c2_i32 : i32
    %22 = arith.extui %21 : i1 to i32
    %c0_i32_21 = arith.constant 0 : i32
    %23 = arith.cmpi ne, %22, %c0_i32_21 : i32
    scf.if %23 {
      %c0_22 = arith.constant 0 : index
      %c0_23 = arith.constant 0 : index
      %24 = vector.load %arg8[%c0_22, %c0_23] : memref<8x25xf32, #tpu.memory_space<vmem>>, vector<8x25xf32>
      %c0_24 = arith.constant 0 : index
      %c0_25 = arith.constant 0 : index
      %25 = vector.load %arg9[%c0_24, %c0_25] : memref<8x25xf32, #tpu.memory_space<vmem>>, vector<8x25xf32>
      %c0_26 = arith.constant 0 : index
      %c0_27 = arith.constant 0 : index
      %26 = vector.load %arg10[%c0_26, %c0_27] : memref<8x1xf32, #tpu.memory_space<vmem>>, vector<8x1xf32>
      %c0_28 = arith.constant 0 : index
      %c0_29 = arith.constant 0 : index
      %27 = vector.load %arg3[%c0_28, %c0_29] : memref<25x25xf32, #tpu.memory_space<vmem>>, vector<25x25xf32>
      %cst_30 = arith.constant dense<0.000000e+00> : vector<8x25xf32>
      %28 = tpu.matmul %24, %27, %cst_30 {dimension_numbers = #tpu.dot_dimension_numbers<[1], [0], [0], [1], [0, 0, 1, 1], [], []>} : vector<8x25xf32>, vector<25x25xf32>, vector<8x25xf32> -> vector<8x25xf32>
      %cst_31 = arith.constant dense<0.000000e+00> : vector<8x25xf32>
      %29 = tpu.matmul %25, %27, %cst_31 {dimension_numbers = #tpu.dot_dimension_numbers<[1], [0], [0], [1], [0, 0, 1, 1], [], []>} : vector<8x25xf32>, vector<25x25xf32>, vector<8x25xf32> -> vector<8x25xf32>
      %30 = arith.addf %28, %24 : vector<8x25xf32>
      %cst_32 = arith.constant 1.000000e+00 : f32
      %31 = vector.broadcast %cst_32 : f32 to vector<8x25xf32>
      %32 = arith.subf %25, %31 : vector<8x25xf32>
      %cst_33 = arith.constant 0.000000e+00 : f32
      %33 = vector.broadcast %cst_33 : f32 to vector<8x25xf32>
      %34 = arith.maximumf %32, %33 : vector<8x25xf32>
      %cst_34 = arith.constant 1.000000e+00 : f32
      %35 = vector.broadcast %cst_34 : f32 to vector<8x25xf32>
      %36 = arith.subf %24, %35 : vector<8x25xf32>
      %cst_35 = arith.constant 0.000000e+00 : f32
      %37 = vector.broadcast %cst_35 : f32 to vector<8x25xf32>
      %38 = arith.maximumf %36, %37 : vector<8x25xf32>
      %cst_36 = arith.constant 9.99999993E-9 : f32
      %39 = vector.broadcast %cst_36 : f32 to vector<8x25xf32>
      %40 = arith.addf %38, %39 : vector<8x25xf32>
      %41 = arith.divf %34, %40 : vector<8x25xf32>
      %42 = arith.mulf %24, %41 : vector<8x25xf32>
      %cst_37 = arith.constant 1.000000e+00 : f32
      %43 = vector.broadcast %cst_37 : f32 to vector<8x25xf32>
      %44 = arith.addf %29, %43 : vector<8x25xf32>
      %cst_38 = arith.constant 1.000000e+00 : f32
      %45 = vector.broadcast %cst_38 : f32 to vector<8x25xf32>
      %46 = arith.addf %28, %45 : vector<8x25xf32>
      %47 = arith.mulf %41, %46 : vector<8x25xf32>
      %48 = arith.subf %44, %47 : vector<8x25xf32>
      %cst_39 = arith.constant 1.000000e+00 : f32
      %49 = vector.broadcast %cst_39 : f32 to vector<8x25xf32>
      %50 = arith.addf %30, %49 : vector<8x25xf32>
      %cst_40 = arith.constant 1.000000e+00 : f32
      %51 = vector.broadcast %cst_40 : f32 to vector<8x25xf32>
      %52 = arith.addf %28, %51 : vector<8x25xf32>
      %53 = arith.divf %50, %52 : vector<8x25xf32>
      %54 = math.log %53 : vector<8x25xf32>
      %55 = arith.mulf %48, %54 : vector<8x25xf32>
      %56 = arith.addf %42, %55 : vector<8x25xf32>
      %57 = arith.mulf %25, %56 : vector<8x25xf32>
      %cst_41 = arith.constant 9.99999993E-9 : f32
      %58 = vector.broadcast %cst_41 : f32 to vector<8x25xf32>
      %59 = arith.addf %24, %58 : vector<8x25xf32>
      %60 = arith.divf %57, %59 : vector<8x25xf32>
      %cst_42 = arith.constant dense<0.000000e+00> : vector<8xf32>
      %61 = vector.multi_reduction <add>, %60, %cst_42 [1] : vector<8x25xf32> to vector<8xf32>
      %62 = vector.shape_cast %61 : vector<8xf32> to vector<8x1xf32>
      %63 = arith.divf %62, %26 : vector<8x1xf32>
      %c0_43 = arith.constant 0 : index
      %c0_44 = arith.constant 0 : index
      %64 = vector.load %arg7[%c0_43, %c0_44] : memref<8x1xf32, #tpu.memory_space<vmem>>, vector<8x1xf32>
      tpu.vector_store %arg7[%c0_43, %c0_44], %63 {strides = array<i32>} : memref<8x1xf32, #tpu.memory_space<vmem>>, vector<8x1xf32>,
    } else {
    }
    return
  }
  func.func @transform_0(%arg0: i32, %arg1: i32) -> (i32, i32) {
    %c0_i32 = arith.constant 0 : i32
    %c0_i32_0 = arith.constant 0 : i32
    %c0_i32_1 = arith.constant 0 : i32
    return %c0_i32, %c0_i32_0 : i32, i32
  }
  func.func @transform_1(%arg0: i32, %arg1: i32) -> (i32, i32) {
    %c0_i32 = arith.constant 0 : i32
    %c0_i32_0 = arith.constant 0 : i32
    %c0_i32_1 = arith.constant 0 : i32
    return %c0_i32, %c0_i32_0 : i32, i32
  }
  func.func @transform_2(%arg0: i32, %arg1: i32) -> (i32, i32) {
    %c0_i32 = arith.constant 0 : i32
    return %arg0, %arg1 : i32, i32
  }
  func.func @transform_3(%arg0: i32, %arg1: i32) -> (i32, i32) {
    %c0_i32 = arith.constant 0 : i32
    return %arg0, %arg1 : i32, i32
  }
  func.func @transform_4(%arg0: i32, %arg1: i32) -> (i32, i32) {
    %c0_i32 = arith.constant 0 : i32
    %c0_i32_0 = arith.constant 0 : i32
    return %c0_i32, %arg1 : i32, i32
  }
  func.func @transform_5(%arg0: i32, %arg1: i32) -> (i32, i32) {
    %c0_i32 = arith.constant 0 : i32
    %c0_i32_0 = arith.constant 0 : i32
    return %arg0, %c0_i32 : i32, i32
  }
}

</mosaic_0001>

<bundles_post_ra>
// kernel: tap_loss.1
= control target key start
LH: loop header
LB: loop body
LE: loop exit
PB: predicated region body
PF: predicated region fallthrough
CT: control target
= control target key end

     0   :  { %10 = vsyncpa [#allocation6], 0  ;;  %s929_s18 = smov 0   ;;  %s931_s19 = smov 0   ;;  %s1027_s0 = inlined_call_operand.vmem [shape: f32[4,25], index: 0, kind: input, shape index: {}]   ;;  %s1028_s1 = inlined_call_operand.vmem [shape: f32[25,25], index: 1, kind: input, shape index: {}]   ;;  %s1029_s2 = inlined_call_operand.vmem [shape: f32[8,384], index: 2, kind: input, shape index: {}]   ;;  %s1030_s3 = inlined_call_operand.vmem [shape: f32[8,384], index: 3, kind: input, shape index: {}]   ;;  %s1031_s4 = inlined_call_operand.vmem [shape: f32[1,384], index: 4, kind: input, shape index: {}]   ;;  %s1032_s5 = inlined_call_operand.vmem [shape: f32[8,1], index: 5, kind: output, shape index: {}]  }
   0x1   :  { %s933_s20 = smov 0  }
   0x2 LB: > { %s692_s21 = sadd.s32 4294967295, %s880_s20   ;;  %s25_s22 = sadd.s32 1, %s876_s19  ;;  %s880_s20 = sphi %s933_s20, %s16_s20   ;;  %s876_s19 = sphi %s931_s19, %s1036_s19   ;;  %s872_s18 = sphi %s929_s18, %s1035_s18  }
   0x3   : > { %p26_p0 = scmp.ge.s32.totalorder %s25_s22, 3  ;;  %p693_p1 = scmp.ge.s32.totalorder %s880_s20, 1 }
   0x4   : > { %p183_p2 = scmp.lt.s32.totalorder %s880_s20, 4  ;;  %p954_p4 = scmp.eq.s32.totalorder %s692_s21, 0 }
   0x5   : > { %s1038_s22 = smov (%p26_p0, %s25_s22), 0  ;;  %s196_s27 = sshll.u32 %s1027_s0, 4  ;;  %s197_s27 = int_to_ptr.vmem [resolvable:$true] %s196_s27 }
   0x6   : > { %p950_p3 = pnand %p693_p1, %p183_p2  ;;  %s827_s28 = scalar_lea.vmem %s197_s27, 64 }
   0x7   : > { %p828_p7 = scmp.ne.s32.totalorder %s197_s27, %s827_s28  ;;  %p835_p11 = scmp.lt.s32.totalorder %s197_s27, %s197_s27 }
   0x8   : > { %p758_p5 = pneg %p950_p3  ;;  %p836_p12 = scmp.lt.s32.totalorder %s827_s28, %s827_s28 }
   0xa   : > { %p759_p6 = pnand %p954_p4, %p758_p5  ;;  %p837_p13 = por %p836_p12, %p835_p11 }
   0xc   : > { %p829_p8 = pneg %p759_p6 }
   0xe   : > { %p830_p9 = pnand %p829_p8, %p828_p7 }
  0x10   : > { %p831_p10 = pneg %p830_p9 }
  0x12   : > { %p838_p0 = pnand %p837_p13, %p831_p10 }
  0x14   : > { %841 = shalt.err (!%p838_p0)
}
  0x15   : > { %s894_s29 = smov [#allocation5]   ;;  %240 = sbr.rel (%p950_p3) target bundleno = 603 (0x25b), region = 40 }
  0x16   : > { %761 = dma.vmem_to_smem (!%p759_p6), %s197_s27, 64, %s894_s29, [#allocation6]  }
  0x1a   : > { %867 = dma.done.wait (%p954_p4), [#allocation6], 64  }
  0x1b   : > { %869 = vsyncadd (%p954_p4), [#allocation6], 4294967232 }
  0x1c   : > { %246 = sfence }
  0x1d   : > { %p284_p1 = scmp.lt.s32.totalorder %s872_s18, 2  ;;  %p700_p2 = scmp.ne.s32.totalorder %s872_s18, 0 }
  0x1f   : > { %s285_s30 = scalar_select %p284_p1, %s872_s18, 2 }
  0x20   : > { %308 = sbr.rel (%p700_p2) target bundleno = 40 (0x28), region = 48 }
  0x21   : > { %s698_s6 = sshll.u32 %s285_s30, 3  ;;  %s300_s9 = scalar_lea.vmem %s1031_s4, %s285_s30 }
  0x22   : > { %s289_s12 = scalar_lea.vmem %s1029_s2, %s698_s6  ;;  %s297_s15 = scalar_lea.vmem %s1030_s3, %s698_s6 }
  0x25   : > { %vm309_vm0 = vcmask 203776   ;;  %vm312_vm1 = vcmask 7168   ;;  %v895_v0 = vmov 0.0  }
  0x26   : > { %310 = vst.msk [vmem:[#allocation2] sm:$0xff] %vm309_vm0, %v895_v0  ;;  %311 = vst.msk [vmem:[#allocation3] sm:$0xff] %vm309_vm0, %v895_v0 }
  0x27   : > { %313 = vst.msk [vmem:[#allocation4] sm:$0xff] %vm312_vm1, %v895_v0 }
  0x28 PF: > { %v314_v1 = vld [vmem:[%s289_s12] sm:$0xff]  ;;  %v317_v4 = vlaneseq  ;;  %v882_v6 = vmov 0.0   ;;  %v886_v7 = vmov 0.0   ;;  %s983_s16 = smov 0  }
  0x29   : > { %v315_v2 = vld [vmem:[%s297_s15] sm:$0xff] }
  0x2a   : > { %v704_v3 = vld [vmem:[%s300_s9] ss:$0 sm:$0xff]  ;;  %v318_v5 = vand.u32 127, %v317_v4 }
  0x2b LB: >> { %s327_s17 = sld [smem:[#allocation5 + %s892_s16]]  ;;  %s328_s21 = sshra.s32 %s892_s16, 7  ;;  %v366_v20 = vstv %s892_s16  ;;  %v896_v21 = vmov 0.0   ;;  %s892_s16 = sphi %s983_s16, %s324_s16   ;;  %v888_v7 = vphi %v886_v7, %v887_v7   ;;  %v884_v6 = vphi %v882_v6, %v883_v6  }
  0x2c   : >> { %s716_s23 = sshll.u32 %s328_s21, 7  ;;  %s333_s24 = sand.u32 127, %s892_s16  ;;  %vm367_vm2 = vcmp.eq.s32.totalorder %v318_v5, %v366_v20 }
  0x2d   : >> { %s717_s25 = sadd.s32 128, %s716_s23  ;;  %s719_s26 = sadd.s32 256, %s716_s23  ;;  %v705_v22 = vsel %vm367_vm2, 1.0, %v896_v21 }
  0x2e   : >> { %s334_s27 = sadd.s32 %s717_s25, %s333_s24  ;;  %s338_s28 = sadd.s32 %s719_s26, %s333_s24 }
  0x2f   : >> { %s335_s29 = sld [smem:[#allocation5 + %s334_s27]]  ;;  %s721_s30 = sadd.s32 384, %s716_s23 }
  0x30   : >> { %s339_s6 = sld [smem:[#allocation5 + %s338_s28]]  ;;  %s342_s7 = sadd.s32 %s721_s30, %s333_s24 }
  0x31   : >> { %s343_s8 = sld [smem:[#allocation5 + %s342_s7]]  ;;  %v344_v8 = vstv %s327_s17  ;;  %s324_s16 = sadd.s32 1, %s892_s16  }
  0x32   : >> { %v345_v9 = vmul.f32 %v344_v8, %v314_v1  ;;  %p321_p3 = scmp.ge.s32.totalorder %s324_s16, 25  }
  0x33   : > { %v374_v29 = vld [vmem:[#allocation2] sm:$0xff] (%p321_p3)  ;;  %vm376_vm3 = vcmask (%p321_p3), 203776   ;;  %v378_v30 = vld [vmem:[#allocation3] sm:$0xff] (%p321_p3)  ;;  %v381_v33 = vld [vmem:[#allocation4] sm:$0xff] (%p321_p3)  ;;  %vm385_vm4 = vcmask (%p321_p3), 7168   ;;  %p706_p4 = scmp.ne.s32.totalorder (%p321_p3), %s872_s18, 2 }
  0x35   : >> { %v346_v10 = vstv %s335_s29 }
  0x36   : >> { %v348_v11 = vstv %s339_s6  ;;  %v347_v12 = vadd.f32 %v346_v10, %v345_v9 }
  0x37   : >> { %v349_v13 = vmul.f32 %v348_v11, %v314_v1  ;;  %v350_v14 = vstv %s343_s8 }
  0x39   : >> { %v351_v15 = vadd.f32 %v350_v14, %v349_v13 }
  0x3b   : >> { %v352_v16 = vmin.f32 %v347_v12, %v351_v15 }
  0x3d   : >> { %v353_v17 = vmax.f32 %v352_v16, 0.0 }
  0x3f   : >> { %v360_v18 = vmul.f32 %v704_v3, %v353_v17  ;;  %v363_v19 = vmul.f32 %v353_v17, %v315_v2 }
  0x41   : >> { %361 = vadd.xlane.f32.xlu0 %v360_v18 }
  0x45   : >> { %364 = vadd.xlane.f32.xlu0 %v363_v19 }
  0x49   : > { %382 = vadd.xlane.f32.xlu0 (%p321_p3), %v315_v2 }
  0xca   : >> { %v362_v23 = vpop.xlane.xlu0 %361 }
  0xcb   : >> { %v370_v24 = vmul.f32 %v705_v22, %v362_v23 }
  0xcd   : >> { %v371_v25 = vadd.f32 %v888_v7, %v370_v24  }
  0xce   : >> { %v365_v26 = vpop.xlane.xlu0 %364 }
  0xcf   : >> { %v372_v27 = vmul.f32 %v705_v22, %v365_v26  ;;  %v887_v7 = vmov %v371_v25   ;;  %323 = sbr.rel (!%p321_p3) target bundleno = 43 (0x2b), region = 96  ;;  %v375_v31 = vadd.f32 (%p321_p3), %v374_v29, %v371_v25 }
  0xd1   : >> { %v373_v28 = vadd.f32 %v884_v6, %v372_v27   ;;  %377 = vst.msk [vmem:[#allocation2] sm:$0xff] (%p321_p3), %vm376_vm3, %v375_v31 }
  0xd2   : > { %v383_v34 = vpop.xlane.xlu0 (%p321_p3), %382 }
  0xd3   : >> { %v883_v6 = vmov %v373_v28   ;;  %v379_v32 = vadd.f32 (%p321_p3), %v378_v30, %v373_v28  ;;  %v384_v35 = vadd.f32 (%p321_p3), %v383_v34, %v381_v33 }
  0xd4   : > { %390 = sbr.rel (%p706_p4) target bundleno = 603 (0x25b), region = 59 }
  0xd5   : > { %380 = vst.msk [vmem:[#allocation3] sm:$0xff] %vm376_vm3, %v379_v32 }
  0xd6   : > { %386 = vst.msk [vmem:[#allocation4] sm:$0xff] %vm385_vm4, %v384_v35 }
  0xd9   : > { %v397_v36 = vld [vmem:[%s1028_s1 + $0x18] sm:$0x1]  ;;  %vm401_vm5 = vcmask 1040384   ;;  %v897_v37 = vmov 0.0   ;;  %v396_v38 = vld [vmem:[%s1028_s1 + $0x10] sm:$0xff]  ;;  %v395_v39 = vld [vmem:[%s1028_s1 + $0x8] sm:$0xff] }
  0xda   : > { %732 = vmatprep.subr.mxu0 %v897_v37  ;;  %743 = vmatprep.subr.mxu1 %v897_v37  ;;  %v394_v40 = vld [vmem:[%s1028_s1] sm:$0xff]  ;;  %vm898_vm6 = vmmov 0  }
  0xdb   : > { %733 = vmatpush3.msk.msra.mxu0 %vm401_vm5, %v397_v36  ;;  %744 = vmatpush3.msk.msra.mxu1 %vm401_vm5, %v397_v36  ;;  %v391_v41 = vld [vmem:[#allocation2] sm:$0xff] }
  0xdc   : > { %734 = vmatprep.subr.mxu0 %v897_v37  ;;  %745 = vmatprep.subr.mxu1 %v897_v37  ;;  %v392_v42 = vld [vmem:[#allocation3] sm:$0xff]  ;;  %v710_v43 = vadd.f32 -1.0, %v391_v41  ;;  %v568_v56 = vadd.f32 1e-08, %v391_v41 }
  0xdd   : > { %735 = vmatpush3.msra.mxu0 %v396_v38  ;;  %746 = vmatpush3.msra.mxu1 %v396_v38  ;;  %v709_v54 = vadd.f32 -1.0, %v392_v42  ;;  %v393_v8 = vld [vmem:[#allocation4] sm:$0xff] }
  0xde   : > { %736 = vmatprep.subr.mxu0 %v897_v37  ;;  %747 = vmatprep.subr.mxu1 %v897_v37  ;;  %v479_v45 = vmax.f32 %v710_v43, 0.0 }
  0xdf   : > { %737 = vmatpush3.msra.mxu0 %v395_v39  ;;  %740 = vmatprep.mubr.msk.f32.mxu0 %vm898_vm6, %v897_v37  ;;  %v477_v57 = vmax.f32 %v709_v54, 0.0 }
  0xe0   : > { %738 = vmatprep.subr.mxu0 %v897_v37  ;;  %748 = vmatpush3.msra.mxu1 %v395_v39  ;;  %v480_v50 = vadd.f32 1e-08, %v479_v45 }
  0xe1   : > { %739 = vmatpush3.msra.mxu0 %v394_v40  ;;  %749 = vmatprep.subr.mxu1 %v897_v37 }
  0xe2   : > { %741 = vmatmul.mubr.msk.f32.vlgmr.msra.gmra.mxu0 %vm376_vm3, %v391_v41  ;;  %750 = vmatpush3.msra.mxu1 %v394_v40 }
  0xe3   : > { %751 = vmatprep.mubr.msk.f32.mxu1 %vm898_vm6, %v897_v37 }
  0xe4   : > { %752 = vmatmul.mubr.msk.f32.vlgmr.msra.gmra.mxu1 %vm376_vm3, %v392_v42 }
 0x1a2   : > { %v471_v44 = vpop.f32.mrf.mxu0 }
 0x1a3   : > { %v557_v46 = vadd.f32 1.0, %v471_v44  ;;  %v475_v51 = vadd.f32 %v471_v44, %v391_v41 }
 0x1a4   : > { %v742_v47 = vpop.f32.mrf.mxu0  ;;  %v553_v48 = vpop.f32.mrf.mxu1 }
 0x1a5   : > { %817 = vrcp.f32 %v557_v46  ;;  %v560_v52 = vadd.f32 1.0, %v475_v51  ;;  %v554_v61 = vadd.f32 1.0, %v553_v48 }
 0x1a6   : > { %v753_v49 = vpop.f32.mrf.mxu1  ;;  %819 = vrcp.f32 %v480_v50 }
 0x1b2   : > { %v818_v53 = vpop.eup %817 }
 0x1b3   : > { %v562_v55 = vmul.f32 %v818_v53, %v560_v52  ;;  %v820_v58 = vpop.eup %819 }
 0x1b4   : > { %v482_v59 = vmul.f32 %v820_v58, %v477_v57 }
 0x1b5   : > { %821 = vlog2.f32 %v562_v55 }
 0x1b6   : > { %823 = vrcp.f32 %v568_v56  ;;  %v558_v60 = vmul.f32 %v557_v46, %v482_v59  ;;  %v483_v1 = vmul.f32 %v482_v59, %v391_v41 }
 0x1b7   : > { %825 = vrcp.f32 %v393_v8 }
 0x1b8   : > { %v559_v63 = vsub.f32 %v554_v61, %v558_v60 }
 0x1c2   : > { %v822_v62 = vpop.eup %821 }
 0x1c3   : > { %v564_v0 = vmul.f32 0.6931472, %v822_v62  ;;  %v824_v4 = vpop.eup %823 }
 0x1c4   : > { %v826_v9 = vpop.eup %825 }
 0x1c5   : > { %v565_v2 = vmul.f32 %v564_v0, %v559_v63 }
 0x1c7   : > { %v566_v3 = vadd.f32 %v565_v2, %v483_v1 }
 0x1c9   : > { %v567_v5 = vmul.f32 %v566_v3, %v392_v42 }
 0x1cb   : > { %v570_v6 = vmul.f32 %v824_v4, %v567_v5 }
 0x1cd   : > { %v571_v7 = vsel %vm376_vm3, %v570_v6, 0.0 }
 0x1ce   : > { %572 = vadd.xlane.f32.xlu0 %v571_v7 }
 0x257   : > { %v573_v10 = vpop.xlane.xlu0 %572 }
 0x258   : > { %v575_v11 = vmul.f32 %v826_v9, %v573_v10 }
 0x25a   : > { %576 = vst.msk [vmem:[%s1032_s5] sm:$0xff] %vm385_vm4, %v575_v11 }
 0x25b PF: > { %s16_s20 = sadd.s32 1, %s880_s20   ;;  %s1035_s18 = smov %s876_s19 }
 0x25c   : > { %p13_p5 = scmp.ge.s32.totalorder %s16_s20, 5   ;;  %s1036_s19 = smov %s1038_s22 }
 0x25e   :  { %15 = sbr.rel (!%p13_p5) target bundleno = 2 (0x2), region = 107 }
 0x263   :  { %596 = vsyncpa [#allocation6], 1 }
 0x264   :  { %598 = vsyncpa [#allocation6 + $0x1], 1 }

</bundles_post_ra>
